<compile_context>
chip_gen: v7x
topology: tpu7x:2x2x1
jax: 0.10.0
libtpu: 0.0.40
codegen_flags: <defaults>
</compile_context>

<pallas_src>
import functools

import jax
import jax.numpy as jnp
from jax.experimental import pallas as pl
from jax.experimental.pallas import tpu as pltpu


def _round_up(x, m):
    return ((x + m - 1) // m) * m


def _cdiv(a, b):
    return (a + b - 1) // b


def _simam_kernel(x_ref, o_ref, *, n_hw, e_lambda):
    # x_ref: (tile_rows, hw) -- one row per (b, c) channel, full spatial field.
    x = x_ref[...].astype(jnp.float32)

    # Two-pass, numerically stable: mean first, then sum of squared deviations.
    mu = jnp.sum(x, axis=-1, keepdims=True) * (1.0 / n_hw)   # (rows, 1)
    d = x - mu
    d2 = d * d
    s = jnp.sum(d2, axis=-1, keepdims=True)                  # (rows, 1)

    # Per-row reciprocal of the denominator (column-sized, cheap), then
    # broadcast-multiply against the full tile.
    inv = 1.0 / (4.0 * (s * (1.0 / (n_hw - 1.0)) + e_lambda))
    y = d2 * inv + 0.5
    o_ref[...] = (x * jax.nn.sigmoid(y)).astype(o_ref.dtype)


def simam(x, e_lambda=1e-4, target_tile_bytes=2 * 1024 * 1024):
    """SimAM forward: x * sigmoid(y), x is NCHW."""
    b, c, h, w = x.shape
    bc, hw = b * c, h * w
    # TODO(synk): h*w == 1 divides by zero (n = h*w - 1), exactly like the
    # PyTorch original -- documented precondition rather than guarded.
    x2d = x.reshape(bc, hw)  # contiguous reshape: no data movement.

    itemsize = jnp.dtype(x.dtype).itemsize
    sublane = {4: 8, 2: 16, 1: 32}.get(itemsize, 8)
    row_bytes = hw * itemsize

    # Rows per tile targeting ~2 MiB/buffer: streaming kernels hit ~85% of the
    # HBM roofline at this tile class; bigger tiles only starve the grid of
    # steps (no double-buffer overlap, idle second TC on v7x).
    tile_rows = max(sublane, (target_tile_bytes // row_bytes) // sublane * sublane)
    # Keep at least ~8 grid steps when there are enough rows for it.
    if bc >= 8 * sublane:
        tile_rows = min(tile_rows, _round_up(_cdiv(bc, 8), sublane))
    if tile_rows >= bc:
        tile_rows = bc  # single full-dim block (exempt from sublane rule)

    grid = (_cdiv(bc, tile_rows),)

    # VMEM: double-buffered in + out blocks plus the in-kernel f32 working set
    # (~4 full-tile f32 temporaries).  Cap well under v7x's 64 MiB/TC.
    tile_bytes = tile_rows * hw * itemsize
    tile_bytes_f32 = tile_rows * hw * 4
    vmem_needed = 4 * tile_bytes + 4 * tile_bytes_f32 + (2 << 20)
    vmem_limit = int(min(48 << 20, max(16 << 20, _round_up(vmem_needed, 1 << 20))))

    kernel = functools.partial(_simam_kernel, n_hw=float(hw), e_lambda=float(e_lambda))

    out2d = pl.pallas_call(
        kernel,
        out_shape=jax.ShapeDtypeStruct((bc, hw), x.dtype),
        grid_spec=pltpu.PrefetchScalarGridSpec(
            num_scalar_prefetch=0,
            grid=grid,
            in_specs=[pl.BlockSpec((tile_rows, hw), lambda i: (i, 0))],
            out_specs=pl.BlockSpec((tile_rows, hw), lambda i: (i, 0)),
        ),
        compiler_params=pltpu.CompilerParams(
            dimension_semantics=("parallel",),
            vmem_limit_bytes=vmem_limit,
        ),
    )(x2d)

    return out2d.reshape(b, c, h, w)


def _simam_ref(x, e_lambda=1e-4):
    # Pure-JAX reference mirroring the PyTorch forward exactly.
    n = x.shape[2] * x.shape[3] - 1
    mu = jnp.mean(x, axis=(2, 3), keepdims=True)
    d2 = (x - mu) ** 2
    y = d2 / (4.0 * (jnp.sum(d2, axis=(2, 3), keepdims=True) / n + e_lambda)) + 0.5
    return x * jax.nn.sigmoid(y)


if __name__ == "__main__":
    key = jax.random.PRNGKey(0)

    # Small NCHW input consistent with the module's forward.
    x = jax.random.normal(key, (2, 4, 16, 16), dtype=jnp.float32)
    out = jax.block_until_ready(simam(x, e_lambda=1e-4))
    ref = _simam_ref(x, e_lambda=1e-4)
    assert out.shape == x.shape and out.dtype == x.dtype
    assert jnp.allclose(out, ref, atol=1e-4, rtol=1e-4), "mismatch vs reference"

    # Ragged-row-grid path: bc=44 with forced 8-row tiles -> cdiv grid with a
    # ragged tail block (and a non-128-multiple hw handled as a full-dim block).
    x2 = jax.random.normal(jax.random.PRNGKey(1), (2, 22, 8, 15), dtype=jnp.float32)
    out2 = jax.block_until_ready(simam(x2, e_lambda=1e-4, target_tile_bytes=8 * 8 * 15 * 4))
    ref2 = _simam_ref(x2, e_lambda=1e-4)
    assert jnp.allclose(out2, ref2, atol=1e-4, rtol=1e-4), "mismatch (ragged)"

    print("KERNEL_OK")
</pallas_src>

<mosaic_0001>
module attributes {stable_mosaic.version = 11 : i64} {
  func.func @_simam_kernel(%arg0: i32, %arg1: memref<8x256xf32, #tpu.memory_space<vmem>>, %arg2: memref<8x256xf32, #tpu.memory_space<vmem>>) attributes {dimension_semantics = [#tpu.dimension_semantics<parallel>], iteration_bounds = array<i64: 1>, scalar_prefetch = 0 : i64, scratch_operands = 0 : i64, tpu.core_type = #tpu.core_type<tc>, window_params = [{transform_indices = @transform_0, window_bounds = array<i64: 8, 256>}, {transform_indices = @transform_1, window_bounds = array<i64: 8, 256>}]} {
    %c0 = arith.constant 0 : index
    %c0_0 = arith.constant 0 : index
    %0 = vector.load %arg1[%c0, %c0_0] : memref<8x256xf32, #tpu.memory_space<vmem>>, vector<8x256xf32>
    %cst = arith.constant dense<0.000000e+00> : vector<8xf32>
    %1 = vector.multi_reduction <add>, %0, %cst [1] : vector<8x256xf32> to vector<8xf32>
    %2 = vector.shape_cast %1 : vector<8xf32> to vector<8x1xf32>
    %cst_1 = arith.constant 3.906250e-03 : f32
    %3 = vector.broadcast %cst_1 : f32 to vector<8x1xf32>
    %4 = arith.mulf %2, %3 : vector<8x1xf32>
    %5 = vector.broadcast %4 : vector<8x1xf32> to vector<8x256xf32>
    %6 = arith.subf %0, %5 : vector<8x256xf32>
    %7 = arith.mulf %6, %6 : vector<8x256xf32>
    %cst_2 = arith.constant dense<0.000000e+00> : vector<8xf32>
    %8 = vector.multi_reduction <add>, %7, %cst_2 [1] : vector<8x256xf32> to vector<8xf32>
    %9 = vector.shape_cast %8 : vector<8xf32> to vector<8x1xf32>
    %cst_3 = arith.constant 0.00392156886 : f32
    %10 = vector.broadcast %cst_3 : f32 to vector<8x1xf32>
    %11 = arith.mulf %9, %10 : vector<8x1xf32>
    %cst_4 = arith.constant 9.99999974E-5 : f32
    %12 = vector.broadcast %cst_4 : f32 to vector<8x1xf32>
    %13 = arith.addf %11, %12 : vector<8x1xf32>
    %cst_5 = arith.constant 4.000000e+00 : f32
    %14 = vector.broadcast %cst_5 : f32 to vector<8x1xf32>
    %15 = arith.mulf %14, %13 : vector<8x1xf32>
    %cst_6 = arith.constant 1.000000e+00 : f32
    %16 = vector.broadcast %cst_6 : f32 to vector<8x1xf32>
    %17 = arith.divf %16, %15 : vector<8x1xf32>
    %18 = vector.broadcast %17 : vector<8x1xf32> to vector<8x256xf32>
    %19 = arith.mulf %7, %18 : vector<8x256xf32>
    %cst_7 = arith.constant 5.000000e-01 : f32
    %20 = vector.broadcast %cst_7 : f32 to vector<8x256xf32>
    %21 = arith.addf %19, %20 : vector<8x256xf32>
    %22 = arith.negf %21 : vector<8x256xf32>
    %23 = math.exp %22 : vector<8x256xf32>
    %cst_8 = arith.constant 1.000000e+00 : f32
    %24 = vector.broadcast %cst_8 : f32 to vector<8x256xf32>
    %25 = arith.addf %24, %23 : vector<8x256xf32>
    %26 = arith.divf %24, %25 : vector<8x256xf32>
    %27 = arith.mulf %0, %26 : vector<8x256xf32>
    %c0_9 = arith.constant 0 : index
    %c0_10 = arith.constant 0 : index
    %28 = vector.load %arg2[%c0_9, %c0_10] : memref<8x256xf32, #tpu.memory_space<vmem>>, vector<8x256xf32>
    tpu.vector_store %arg2[%c0_9, %c0_10], %27 {strides = array<i32>} : memref<8x256xf32, #tpu.memory_space<vmem>>, vector<8x256xf32>,
    return
  }
  func.func @transform_0(%arg0: i32) -> (i32, i32) {
    %c0_i32 = arith.constant 0 : i32
    %c0_i32_0 = arith.constant 0 : i32
    return %arg0, %c0_i32 : i32, i32
  }
  func.func @transform_1(%arg0: i32) -> (i32, i32) {
    %c0_i32 = arith.constant 0 : i32
    %c0_i32_0 = arith.constant 0 : i32
    return %arg0, %c0_i32 : i32, i32
  }
}

</mosaic_0001>

<bundles_post_ra>
// kernel: tpu_custom_call.1
= control target key start
LH: loop header
LB: loop body
LE: loop exit
PB: predicated region body
PF: predicated region fallthrough
CT: control target
= control target key end

     0   :  { %6 = vsyncpa [#allocation3], 0  ;;  %s172_s0 = inlined_call_operand.hbm [shape: f32[8,256], index: 0, kind: input, shape index: {}]   ;;  %s173_s1 = inlined_call_operand.hbm [shape: f32[8,256], index: 1, kind: output, shape index: {}]  }
   0x1   :  { %7 = vsyncpa [#allocation4], 0  ;;  %s136_s6 = smov [#allocation2]   ;;  %s88_s10 = scalar_lea.hbm %s172_s0, 256 }
   0x2   :  { %s14_s7 = sshll.u32 %s136_s6, 4  ;;  %p89_p0 = scmp.ne.s32.totalorder %s172_s0, %s88_s10  ;;  %s15_s7 = int_to_ptr.vmem [resolvable:$true] %s14_s7 }
   0x3   :  { %p92_p1 = scmp.lt.u32.totalorder %s88_s10, %s172_s0 }
   0x5   :  { %p94_p2 = pnand %p92_p1, %p89_p0 }
   0x7   :  { %97 = shalt.err (!%p94_p2)
}
   0x8   :  { %s98_s15 = scalar_lea.vmem %s15_s7, 256  ;;  %p103_p4 = scmp.lt.s32.totalorder %s15_s7, %s15_s7 }
   0x9   :  { %p99_p3 = scmp.ne.s32.totalorder %s15_s7, %s98_s15  ;;  %p104_p5 = scmp.lt.s32.totalorder %s98_s15, %s98_s15 }
   0xb   :  { %p105_p6 = por %p104_p5, %p103_p4 }
   0xd   :  { %p106_p7 = pnand %p105_p6, %p99_p3 }
   0xf   :  { %109 = shalt.err (!%p106_p7)
}
  0x10   :  { %17 = dma.hbm_to_vmem [thread:$0]  %s172_s0, 256, %s15_s7, [#allocation3]  }
  0x11   :  { %132 = dma.done.wait [#allocation3], 256  }
  0x12   :  { %133 = vsyncadd [#allocation3], 4294967040  ;;  %v21_v0 = vld [vmem:[#allocation2] sm:$0xff]  ;;  %v22_v1 = vld [vmem:[#allocation2 + $0x8] sm:$0xff]  ;;  %s137_s0 = smov [#allocation5]  }
  0x13   :  { %v23_v2 = vadd.f32 %v22_v1, %v21_v0  ;;  %s65_s18 = sshll.u32 %s137_s0, 4  ;;  %s66_s18 = int_to_ptr.vmem [resolvable:$true] %s65_s18 }
  0x14   :  { %s110_s19 = scalar_lea.vmem %s66_s18, 256  ;;  %p115_p9 = scmp.lt.s32.totalorder %s66_s18, %s66_s18 }
  0x15   :  { %24 = vadd.xlane.f32.xlu0 %v23_v2  ;;  %p111_p8 = scmp.ne.s32.totalorder %s66_s18, %s110_s19  ;;  %p116_p10 = scmp.lt.s32.totalorder %s110_s19, %s110_s19 }
  0x17   :  { %p117_p11 = por %p116_p10, %p115_p9 }
  0x19   :  { %p118_p12 = pnand %p117_p11, %p111_p8 }
  0xa2   :  { %v25_v3 = vpop.xlane.xlu0 %24 }
  0xa3   :  { %v26_v4 = vmul.f32 0.00390625, %v25_v3 }
  0xa5   :  { %v27_v5 = vsub.f32 %v21_v0, %v26_v4  ;;  %v28_v6 = vsub.f32 %v22_v1, %v26_v4 }
  0xa7   :  { %v29_v7 = vmul.f32 %v27_v5, %v27_v5  ;;  %v30_v8 = vmul.f32 %v28_v6, %v28_v6 }
  0xa9   :  { %v31_v9 = vadd.f32 %v30_v8, %v29_v7 }
  0xab   :  { %32 = vadd.xlane.f32.xlu0 %v31_v9 }
 0x138   :  { %v33_v10 = vpop.xlane.xlu0 %32 }
 0x139   :  { %v34_v11 = vmul.f32 0.003921569, %v33_v10 }
 0x13b   :  { %v35_v12 = vadd.f32 0.0001, %v34_v11 }
 0x13d   :  { %v36_v13 = vmul.f32 4.0, %v35_v12 }
 0x13f   :  { %78 = vrcp.f32 %v36_v13 }
 0x149   :  { %v79_v14 = vpop.eup %78 }
 0x14a   :  { %v39_v15 = vmul.f32 %v79_v14, %v29_v7  ;;  %v40_v16 = vmul.f32 %v79_v14, %v30_v8 }
 0x14c   :  { %v41_v17 = vadd.f32 0.5, %v39_v15  ;;  %v42_v18 = vadd.f32 0.5, %v40_v16 }
 0x14e   :  { %v74_v19 = vmul.f32 -1.442695, %v41_v17  ;;  %v75_v20 = vmul.f32 -1.442695, %v42_v18 }
 0x150   :  { %80 = vpow2.f32 %v74_v19 }
 0x151   :  { %82 = vpow2.f32 %v75_v20 }
 0x15a   :  { %v81_v21 = vpop.eup %80 }
 0x15b   :  { %v83_v22 = vpop.eup %82  ;;  %v49_v23 = vadd.f32 1.0, %v81_v21 }
 0x15c   :  { %v50_v24 = vadd.f32 1.0, %v83_v22 }
 0x15d   :  { %84 = vrcp.f32 %v49_v23 }
 0x15e   :  { %86 = vrcp.f32 %v50_v24 }
 0x167   :  { %v85_v25 = vpop.eup %84 }
 0x168   :  { %v87_v26 = vpop.eup %86  ;;  %v55_v27 = vmul.f32 %v85_v25, %v21_v0 }
 0x169   :  { %v56_v28 = vmul.f32 %v87_v26, %v22_v1 }
 0x16a   :  { %57 = vst [vmem:[#allocation5] sm:$0xff] %v55_v27 }
 0x16b   :  { %58 = vst [vmem:[#allocation5 + $0x8] sm:$0xff] %v56_v28 }
 0x16c   :  { %121 = shalt.err (!%p118_p12)
}
 0x16d   :  { %s122_s22 = scalar_lea.hbm %s173_s1, 256 }
 0x16e   :  { %p123_p13 = scmp.ne.s32.totalorder %s173_s1, %s122_s22  ;;  %p126_p0 = scmp.lt.u32.totalorder %s122_s22, %s173_s1 }
 0x170   :  { %p128_p1 = pnand %p126_p0, %p123_p13 }
 0x172   :  { %131 = shalt.err (!%p128_p1)
}
 0x173   :  { %68 = dma.vmem_to_hbm [thread:$0]  %s66_s18, 256, %s173_s1, [#allocation4]  }
 0x174   :  { %134 = dma.done.wait [#allocation4], 256  }
 0x175   :  { %135 = vsyncadd [#allocation4], 4294967040 }
 0x176   :  { %72 = vsyncpa [#allocation3], 1 }
 0x177   :  { %73 = vsyncpa [#allocation4], 1 }

</bundles_post_ra>
